<compile_context>
chip_gen: v6e
topology: v6e:2x2x1
jax: 0.10.0
libtpu: 0.0.40
codegen_flags: <defaults>
</compile_context>

<pallas_src>
import functools

import jax
import jax.numpy as jnp
from jax import lax
from jax.experimental import pallas as pl
from jax.experimental.pallas import tpu as pltpu


def _round_up(x, m):
    return (x + m - 1) // m * m


# Contract x(tm, tk) with w(tn, tk) over the K (last) dim of both -> (tm, tn).
# This lets us keep the weight in native PyTorch (out, in) layout.
_CONTRACT_RHS_LAST = (((1,), (1,)), ((), ()))


def _fc_kernel_single_k(x_ref, w_ref, b_ref, o_ref, *, negative_slope):
    """Whole K in one tile: dot + bias + LeakyReLU fused, no scratch."""
    y = lax.dot_general(x_ref[...], w_ref[...],
                        dimension_numbers=_CONTRACT_RHS_LAST,
                        preferred_element_type=jnp.float32)
    y = y + b_ref[...]                               # bias broadcast over rows
    y = jnp.where(y > 0, y, negative_slope * y)      # LeakyReLU(0.1)
    o_ref[...] = y.astype(o_ref.dtype)


def _fc_kernel_ktiled(x_ref, w_ref, b_ref, o_ref, acc_ref, *, negative_slope):
    """K-tiled path: grid axis 2 walks the reduction; f32 VMEM accumulator."""
    k = pl.program_id(2)

    @pl.when(k == 0)
    def _init():
        # Fold the bias into the accumulator init (saves a VPU add in finalize).
        acc_ref[...] = jnp.broadcast_to(b_ref[...], acc_ref.shape)

    acc_ref[...] += lax.dot_general(x_ref[...], w_ref[...],
                                    dimension_numbers=_CONTRACT_RHS_LAST,
                                    preferred_element_type=jnp.float32)

    @pl.when(k == pl.num_programs(2) - 1)
    def _finalize():
        y = acc_ref[...]
        y = jnp.where(y > 0, y, negative_slope * y)  # LeakyReLU(0.1)
        o_ref[...] = y.astype(o_ref.dtype)


def _vmem_budget():
    """Generation-aware VMEM capacity query with a conservative fallback."""
    try:
        return int(pltpu.get_tpu_info().vmem_capacity_bytes)
    except Exception:
        return 64 * 1024 * 1024  # assume the smallest (v7x-sized) VMEM


def fully_connected(x, weight, bias, negative_slope=0.1,
                    compute_dtype=jnp.bfloat16, out_dtype=None):
    """y = LeakyReLU_0.1(x @ weight.T + bias), matching the PyTorch module.

    x      : (M, K)  float input            (batch x in_features)
    weight : (N, K)  PyTorch Linear weight  (out_features x in_features)
    bias   : (N,)    PyTorch Linear bias
    compute_dtype : MXU operand dtype (bf16 default; f32 is a debug mode).
    Accumulation / bias / epilogue are always f32; output defaults to x.dtype.
    """
    M, K = x.shape
    N = weight.shape[0]
    assert weight.shape == (N, K) and bias.shape == (N,)
    out_dtype = x.dtype if out_dtype is None else out_dtype

    # ---- generation-aware tile caps -------------------------------------
    vmem_bytes = _vmem_budget()
    if vmem_bytes >= 100 * 1024 * 1024:            # v5e / v6e (128 MiB VMEM)
        tm_cap, tn_cap, tk_cap = 512, 1024, 1024
        vmem_limit = 96 * 1024 * 1024
    else:                                          # v7x (64 MiB VMEM)
        tm_cap, tn_cap, tk_cap = 256, 1024, 512
        vmem_limit = 48 * 1024 * 1024

    # bf16 packs 2 rows per sublane -> align tm to 16 (8 for f32).
    pack = 16 if compute_dtype == jnp.bfloat16 else 8

    tm = min(_round_up(M, pack), tm_cap)
    if M % 8 == 0 and M % pack != 0 and M <= tm_cap:
        tm = M                  # small 8-aligned M: skip the M pad + out slice
    tn = min(_round_up(N, 128), tn_cap)            # lane-dense output tiles
    tk = min(_round_up(K, 128), tk_cap)

    Mp, Np, Kp = _round_up(M, tm), _round_up(N, tn), _round_up(K, tk)

    # v7x megacore: make sure there are >=2 parallel blocks when possible.
    if Mp // tm == 1 and Np // tn == 1 and Np >= 256:
        tn = _round_up(Np // 2, 128)
        Np = _round_up(N, tn)

    # ---- pad only when required (zero pad along K is exact) -------------
    xc = x.astype(compute_dtype)
    wc = weight.astype(compute_dtype)
    bc = bias.astype(jnp.float32)
    if (Mp, Kp) != (M, K):
        xc = jnp.pad(xc, ((0, Mp - M), (0, Kp - K)))
    if (Np, Kp) != (N, K):
        wc = jnp.pad(wc, ((0, Np - N), (0, Kp - K)))
    if Np != N:
        bc = jnp.pad(bc, (0, Np - N))
    bc = bc.reshape(1, Np)

    # ---- grid / specs ----------------------------------------------------
    if Kp == tk:
        # Single K step: no reduction axis, no accumulator scratch.
        grid = (Mp // tm, Np // tn)
        kernel = functools.partial(_fc_kernel_single_k,
                                   negative_slope=negative_slope)
        in_specs = [
            pl.BlockSpec((tm, Kp), lambda i, j: (i, 0)),   # x rows
            pl.BlockSpec((tn, Kp), lambda i, j: (j, 0)),   # weight (native N,K)
            pl.BlockSpec((1, tn), lambda i, j: (0, j)),    # bias
        ]
        out_specs = pl.BlockSpec((tm, tn), lambda i, j: (i, j))
        scratch_shapes = []
        dims = ("parallel", "parallel")
    else:
        grid = (Mp // tm, Np // tn, Kp // tk)
        kernel = functools.partial(_fc_kernel_ktiled,
                                   negative_slope=negative_slope)
        in_specs = [
            pl.BlockSpec((tm, tk), lambda i, j, k: (i, k)),  # x tile
            pl.BlockSpec((tn, tk), lambda i, j, k: (j, k)),  # weight tile
            pl.BlockSpec((1, tn), lambda i, j, k: (0, j)),   # bias tile
        ]
        out_specs = pl.BlockSpec((tm, tn), lambda i, j, k: (i, j))
        scratch_shapes = [pltpu.VMEM((tm, tn), jnp.float32)]
        dims = ("parallel", "parallel", "arbitrary")

    out = pl.pallas_call(
        kernel,
        out_shape=jax.ShapeDtypeStruct((Mp, Np), out_dtype),
        grid_spec=pltpu.PrefetchScalarGridSpec(
            num_scalar_prefetch=0,
            grid=grid,
            in_specs=in_specs,
            out_specs=out_specs,
            scratch_shapes=scratch_shapes,
        ),
        compiler_params=pltpu.CompilerParams(
            dimension_semantics=dims,
            vmem_limit_bytes=vmem_limit,
        ),
    )(xc, wc, bc)

    if (Mp, Np) != (M, N):
        out = out[:M, :N]
    return out


def reference_fully_connected(x, weight, bias, negative_slope=0.1):
    """Pure-JAX reference mirroring the PyTorch forward."""
    y = x @ weight.T + bias
    return jnp.where(y > 0, y, negative_slope * y)


if __name__ == "__main__":
    key = jax.random.PRNGKey(0)
    kx, kw, kb = jax.random.split(key, 3)

    batch, in_features, out_features = 8, 32, 64

    x = jax.random.normal(kx, (batch, in_features), jnp.float32)
    # Deterministic synthetic Linear parameters (PyTorch layout: (out, in)).
    w = 0.1 * jax.random.normal(kw, (out_features, in_features), jnp.float32)
    b = 0.1 * jax.random.normal(kb, (out_features,), jnp.float32)

    ref = reference_fully_connected(x, w, b)

    # Default (bf16 operands, f32 accumulation) path — the production path.
    out = jax.block_until_ready(fully_connected(x, w, b))
    assert out.shape == ref.shape, (out.shape, ref.shape)
    max_err = float(jnp.max(jnp.abs(out - ref)))
    assert jnp.allclose(out, ref, atol=5e-2, rtol=5e-2), f"bf16 max_err={max_err}"

    # f32 debug path — tight tolerance.
    out_f32 = jax.block_until_ready(
        fully_connected(x, w, b, compute_dtype=jnp.float32))
    max_err_f32 = float(jnp.max(jnp.abs(out_f32 - ref)))
    assert jnp.allclose(out_f32, ref, atol=1e-4, rtol=1e-4), (
        f"f32 max_err={max_err_f32}")

    print("KERNEL_OK")
</pallas_src>

<mosaic_0001>
module attributes {stable_mosaic.version = 11 : i64} {
  func.func @_fc_kernel_single_k(%arg0: i32, %arg1: i32, %arg2: memref<8x128xbf16, #tpu.memory_space<vmem>>, %arg3: memref<128x128xbf16, #tpu.memory_space<vmem>>, %arg4: memref<1x128xf32, #tpu.memory_space<vmem>>, %arg5: memref<8x128xf32, #tpu.memory_space<vmem>>) attributes {dimension_semantics = [#tpu.dimension_semantics<parallel>, #tpu.dimension_semantics<parallel>], iteration_bounds = array<i64: 1, 1>, scalar_prefetch = 0 : i64, scratch_operands = 0 : i64, tpu.core_type = #tpu.core_type<tc>, window_params = [{transform_indices = @transform_0, window_bounds = array<i64: 8, 128>}, {transform_indices = @transform_1, window_bounds = array<i64: 128, 128>}, {transform_indices = @transform_2, window_bounds = array<i64: 1, 128>}, {transform_indices = @transform_3, window_bounds = array<i64: 8, 128>}]} {
    %c0 = arith.constant 0 : index
    %c0_0 = arith.constant 0 : index
    %0 = vector.load %arg2[%c0, %c0_0] : memref<8x128xbf16, #tpu.memory_space<vmem>>, vector<8x128xbf16>
    %c0_1 = arith.constant 0 : index
    %c0_2 = arith.constant 0 : index
    %1 = vector.load %arg3[%c0_1, %c0_2] : memref<128x128xbf16, #tpu.memory_space<vmem>>, vector<128x128xbf16>
    %cst = arith.constant dense<0.000000e+00> : vector<8x128xf32>
    %2 = tpu.matmul %0, %1, %cst {dimension_numbers = #tpu.dot_dimension_numbers<[1], [1], [0], [0], [0, 0, 1, 0], [], []>} : vector<8x128xbf16>, vector<128x128xbf16>, vector<8x128xf32> -> vector<8x128xf32>
    %c0_3 = arith.constant 0 : index
    %c0_4 = arith.constant 0 : index
    %3 = vector.load %arg4[%c0_3, %c0_4] : memref<1x128xf32, #tpu.memory_space<vmem>>, vector<1x128xf32>
    %4 = vector.broadcast %3 : vector<1x128xf32> to vector<8x128xf32>
    %5 = arith.addf %2, %4 : vector<8x128xf32>
    %cst_5 = arith.constant 0.000000e+00 : f32
    %6 = vector.broadcast %cst_5 : f32 to vector<8x128xf32>
    %7 = arith.cmpf ogt, %5, %6 : vector<8x128xf32>
    %cst_6 = arith.constant 1.000000e-01 : f32
    %8 = vector.broadcast %cst_6 : f32 to vector<8x128xf32>
    %9 = arith.mulf %8, %5 : vector<8x128xf32>
    %10 = arith.select %7, %5, %9 : vector<8x128xi1>, vector<8x128xf32>
    %c0_7 = arith.constant 0 : index
    %c0_8 = arith.constant 0 : index
    %11 = vector.load %arg5[%c0_7, %c0_8] : memref<8x128xf32, #tpu.memory_space<vmem>>, vector<8x128xf32>
    tpu.vector_store %arg5[%c0_7, %c0_8], %10 {strides = array<i32>} : memref<8x128xf32, #tpu.memory_space<vmem>>, vector<8x128xf32>,
    return
  }
  func.func @transform_0(%arg0: i32, %arg1: i32) -> (i32, i32) {
    %c0_i32 = arith.constant 0 : i32
    %c0_i32_0 = arith.constant 0 : i32
    return %arg0, %c0_i32 : i32, i32
  }
  func.func @transform_1(%arg0: i32, %arg1: i32) -> (i32, i32) {
    %c0_i32 = arith.constant 0 : i32
    %c0_i32_0 = arith.constant 0 : i32
    return %arg1, %c0_i32 : i32, i32
  }
  func.func @transform_2(%arg0: i32, %arg1: i32) -> (i32, i32) {
    %c0_i32 = arith.constant 0 : i32
    %c0_i32_0 = arith.constant 0 : i32
    return %c0_i32, %arg1 : i32, i32
  }
  func.func @transform_3(%arg0: i32, %arg1: i32) -> (i32, i32) {
    %c0_i32 = arith.constant 0 : i32
    return %arg0, %arg1 : i32, i32
  }
}

</mosaic_0001>

<bundles_post_ra>
// kernel: tpu_custom_call.1
= control target key start
LH: loop header
LB: loop body
LE: loop exit
PB: predicated region body
PF: predicated region fallthrough
CT: control target
= control target key end

     0   :  { %8 = vsyncpa [#allocation3], 0  ;;  %s332_s0 = inlined_call_operand.hbm [shape: bf16[8,128], index: 0, kind: input, shape index: {}]   ;;  %s333_s1 = inlined_call_operand.hbm [shape: bf16[128,128], index: 1, kind: input, shape index: {}]   ;;  %s334_s2 = inlined_call_operand.vmem [shape: f32[1,128], index: 2, kind: input, shape index: {}]   ;;  %s335_s3 = inlined_call_operand.hbm [shape: f32[8,128], index: 3, kind: output, shape index: {}]  }
   0x1   :  { %9 = vsyncpa [#allocation6], 0 }
   0x2   :  { %10 = vsyncpa [#allocation4], 0  ;;  %s293_s12 = smov [#allocation2]   ;;  %s294_s14 = smov [#allocation5]  }
   0x3   :  { %s17_s13 = sshll.u32 %s293_s12, 4  ;;  %s26_s15 = sshll.u32 %s294_s14, 4  ;;  %s18_s13 = int_to_ptr.vmem [resolvable:$true] %s17_s13  ;;  %s27_s15 = int_to_ptr.vmem [resolvable:$true] %s26_s15 }
   0x4   :  { %s235_s16 = scalar_lea.vmem %s18_s13, 64  ;;  %p240_p1 = scmp.lt.s32.totalorder %s18_s13, %s18_s13 }
   0x5   :  { %p236_p0 = scmp.ne.s32.totalorder %s18_s13, %s235_s16  ;;  %p241_p2 = scmp.lt.s32.totalorder %s235_s16, %s235_s16 }
   0x7   :  { %p242_p3 = por %p241_p2, %p240_p1 }
   0x9   :  { %p243_p4 = pnand %p242_p3, %p236_p0 }
   0xb   :  { %246 = shalt.err (!%p243_p4)
}
   0xc   :  { %20 = dma.hbm_to_vmem [thread:$0]  %s332_s0, 64, %s18_s13, [#allocation3]  }
   0xd   :  { %s255_s19 = scalar_lea.vmem %s27_s15, 1024  ;;  %p260_p6 = scmp.lt.s32.totalorder %s27_s15, %s27_s15 }
   0xe   :  { %p256_p5 = scmp.ne.s32.totalorder %s27_s15, %s255_s19  ;;  %p261_p7 = scmp.lt.s32.totalorder %s255_s19, %s255_s19 }
  0x10   :  { %p262_p8 = por %p261_p7, %p260_p6 }
  0x12   :  { %p263_p9 = pnand %p262_p8, %p256_p5 }
  0x14   :  { %266 = shalt.err (!%p263_p9)
}
  0x15   :  { %s295_s20 = smov 64   ;;  %s296_s21 = smov 4  }
  0x16   :  { %32 = dma.hbm_to_vmem [thread:$0]  %s333_s1, 1024, %s27_s15, [#allocation6], %s295_s20, %s295_s20, %s296_s21  }
  0x17   :  { %287 = dma.done.wait [#allocation3], 64  }
  0x18   :  { %288 = vsyncadd [#allocation3], 4294967232 }
  0x19   :  { %289 = dma.done.wait [#allocation6], 1024  }
  0x1a   :  { %290 = vsyncadd [#allocation6], 4294966272  ;;  %v297_v0 = vmov 0.0   ;;  %vm298_vm0 = vmmov 0   ;;  %v219_v1 = vld [vmem:[#allocation5 + $0x38] sm:$0xff]   ;;  %v220_v2 = vld [vmem:[#allocation5 + $0x30] sm:$0xff]  }
  0x1b   :  { %192 = vmatprep.subr.bf16.mxu0 %v297_v0  ;;  %208 = vmatprep.mubr.msk.bf16.mxu0 %vm298_vm0, %v297_v0  ;;  %v221_v3 = vld [vmem:[#allocation5 + $0x28] sm:$0xff]   ;;  %v222_v4 = vld [vmem:[#allocation5 + $0x20] sm:$0xff]   ;;  %v223_v5 = vld [vmem:[#allocation5 + $0x18] sm:$0xff]   ;;  %s299_s24 = smov [#allocation7]  }
  0x1c   :  { %193 = vmatpush3.bf16.xpose.msra.mxu0 %v219_v1  ;;  %v224_v6 = vld [vmem:[#allocation5 + $0x10] sm:$0xff]   ;;  %v225_v7 = vld [vmem:[#allocation5 + $0x8] sm:$0xff]   ;;  %v226_v8 = vld [vmem:[#allocation5] sm:$0xff]   ;;  %s164_s25 = sshll.u32 %s299_s24, 4  ;;  %s165_s25 = int_to_ptr.vmem [resolvable:$true] %s164_s25 }
  0x1d   :  { %194 = vmatprep.subr.bf16.mxu0 %v297_v0  ;;  %v42_v9 = vld [vmem:[#allocation2] sm:$0xf]  ;;  %s267_s26 = scalar_lea.vmem %s165_s25, 128  ;;  %p272_p11 = scmp.lt.s32.totalorder %s165_s25, %s165_s25 }
  0x1e   :  { %v174_v10 = vld [vmem:[%s334_s2] ss:$0 sm:$0xff]  ;;  %p268_p10 = scmp.ne.s32.totalorder %s165_s25, %s267_s26  ;;  %p273_p12 = scmp.lt.s32.totalorder %s267_s26, %s267_s26 }
  0x20   :  { %p274_p13 = por %p273_p12, %p272_p11 }
  0x22   :  { %p275_p0 = pnand %p274_p13, %p268_p10 }
  0x24   :  { %195 = vmatpush3.bf16.xpose.msra.mxu0 %v220_v2 }
  0x25   :  { %196 = vmatprep.subr.bf16.mxu0 %v297_v0 }
  0x2c   :  { %197 = vmatpush3.bf16.xpose.msra.mxu0 %v221_v3 }
  0x2d   :  { %198 = vmatprep.subr.bf16.mxu0 %v297_v0 }
  0x34   :  { %199 = vmatpush3.bf16.xpose.msra.mxu0 %v222_v4 }
  0x35   :  { %200 = vmatprep.subr.bf16.mxu0 %v297_v0 }
  0x3c   :  { %201 = vmatpush3.bf16.xpose.msra.mxu0 %v223_v5 }
  0x3d   :  { %202 = vmatprep.subr.bf16.mxu0 %v297_v0 }
  0x44   :  { %203 = vmatpush3.bf16.xpose.msra.mxu0 %v224_v6 }
  0x45   :  { %204 = vmatprep.subr.bf16.mxu0 %v297_v0 }
  0x4c   :  { %205 = vmatpush3.bf16.xpose.msra.mxu0 %v225_v7 }
  0x4d   :  { %206 = vmatprep.subr.bf16.mxu0 %v297_v0 }
  0x54   :  { %207 = vmatpush3.bf16.xpose.msra.mxu0 %v226_v8 }
  0x5b   :  { %209 = vmatmul.mubr.bf16.vlgmr.msra.gmra.mxu0 %v42_v9 }
 0x11b   :  { %v148_v11 = vpop.f32.mrf.mxu0 }
 0x11c   :  { %v149_v12 = vadd.f32 %v174_v10, %v148_v11 }
 0x11d   :  { %v210_v13 = vpop.f32.mrf.mxu0 }
 0x11e   :  { %v155_v14 = vmul.f32 0.1, %v149_v12  ;;  %vm154_vm1 = vcmp.gt.f32.partialorder %v149_v12, 0.0 }
 0x11f   :  { %v151_v15 = vpop.f32.mrf.mxu0 }
 0x120   :  { %v156_v16 = vsel %vm154_vm1, %v149_v12, %v155_v14 }
 0x121   :  { %v211_v17 = vpop.f32.mrf.mxu0  ;;  %157 = vst [vmem:[#allocation7] sm:$0xff] %v156_v16 }
 0x122   :  { %278 = shalt.err (!%p275_p0)
}
 0x123   :  { %167 = dma.vmem_to_hbm [thread:$0]  %s165_s25, 128, %s335_s3, [#allocation4]  }
 0x124   :  { %291 = dma.done.wait [#allocation4], 128  }
 0x125   :  { %292 = vsyncadd [#allocation4], 4294967168 }
 0x126   :  { %171 = vsyncpa [#allocation3], 1 }
 0x127   :  { %172 = vsyncpa [#allocation6], 1 }
 0x128   :  { %173 = vsyncpa [#allocation4], 1 }

</bundles_post_ra>
